<compile_context>
chip_gen: v5e
topology: v5e:2x2
jax: 0.10.0
libtpu: 0.0.40
codegen_flags: <defaults>
</compile_context>

<pallas_src>
import functools

import jax
import jax.numpy as jnp
from jax.experimental import pallas as pl
from jax.experimental.pallas import tpu as pltpu

_LANES = 128            # lane width of a vreg
_MAX_TILE_ROWS = 2048   # 2048 * 128 * 4 B = 1 MiB per f32 tile (fits v5e/v6e/v7x VMEM easily)


def _dropout_kernel(seed_ref, x_ref, o_ref, *, p: float):
    """Elementwise dropout on one (rows, 128) VMEM tile using a stateless hash PRNG."""
    rows, lanes = x_ref.shape

    # Global element index of every lane in this tile (uint32, wraps harmlessly).
    row0 = (pl.program_id(0) * rows).astype(jnp.uint32)
    r = jax.lax.broadcasted_iota(jnp.uint32, (rows, lanes), 0)
    c = jax.lax.broadcasted_iota(jnp.uint32, (rows, lanes), 1)
    idx = (r + row0) * jnp.uint32(lanes) + c

    seed = seed_ref[0].astype(jnp.uint32)

    # splitmix32-style stateless hash of (seed, global index) -> 32 random bits.
    z = idx * jnp.uint32(0x9E3779B9) + seed * jnp.uint32(0x85EBCA6B) + jnp.uint32(0x6A09E667)
    z = (z ^ (z >> 16)) * jnp.uint32(0x21F0AAAD)
    z = (z ^ (z >> 15)) * jnp.uint32(0x735A2D97)
    z = z ^ (z >> 15)

    # drop  <=>  bits31 < p * 2^31   (signed compare on the top 31 random bits;
    # the clamp introduces a ~2^-31 bias in drop probability -- negligible).
    bits31 = (z >> 1).astype(jnp.int32)
    threshold = jnp.int32(min(int(p * 2147483648.0), 2147483647))
    keep = bits31 >= threshold

    # Compute in the native dtype (weak-typed python scalars keep bf16 bf16 etc.).
    scale = 1.0 / (1.0 - p)
    x = x_ref[...]
    o_ref[...] = jnp.where(keep, x * scale, jnp.zeros_like(x)).astype(o_ref.dtype)


def dropout(x: jax.Array, p: float, *, seed: int = 0, training: bool = True) -> jax.Array:
    """Pallas-backed Dropout.forward."""
    if (not training) or p <= 0.0:
        return x  # matches `if not self.training or self.p <= 0: return inputs`
    if p >= 1.0:
        # scale = 1/(1-p) would be inf; PyTorch semantics: everything dropped.
        return jnp.zeros_like(x)

    orig_shape = x.shape
    n = x.size

    # Lane-dense [rows, 128] slab; rows padded to the row-block size only if needed.
    nrows = pl.cdiv(n, _LANES)
    block_rows = min(_MAX_TILE_ROWS, ((nrows + 7) // 8) * 8)   # multiple of 8 sublanes
    padded_rows = pl.cdiv(nrows, block_rows) * block_rows
    pad = padded_rows * _LANES - n

    flat = x.reshape(-1)
    if pad:  # only ragged sizes pay for the pad / tail slice
        flat = jnp.pad(flat, (0, pad))
    xf = flat.reshape(padded_rows, _LANES)

    seed_arr = jnp.array([seed], dtype=jnp.int32)
    grid = (padded_rows // block_rows,)

    out = pl.pallas_call(
        functools.partial(_dropout_kernel, p=float(p)),
        out_shape=jax.ShapeDtypeStruct((padded_rows, _LANES), x.dtype),
        grid_spec=pltpu.PrefetchScalarGridSpec(
            num_scalar_prefetch=1,
            grid=grid,
            in_specs=[pl.BlockSpec((block_rows, _LANES), lambda i, seed_ref: (i, 0))],
            out_specs=pl.BlockSpec((block_rows, _LANES), lambda i, seed_ref: (i, 0)),
        ),
        compiler_params=pltpu.CompilerParams(
            dimension_semantics=("parallel",),  # shard row-tiles across TCs (v7x megacore)
        ),
    )(seed_arr, xf)

    out_flat = out.reshape(-1)
    if pad:
        out_flat = out_flat[:n]
    return out_flat.reshape(orig_shape)


if __name__ == "__main__":
    key = jax.random.PRNGKey(0)
    # Small NCHW input consistent with typical usage of this Dropout module.
    x = jax.random.normal(key, (2, 4, 16, 16), dtype=jnp.float32)
    p = 0.5

    # Train-mode dropout (the hot path, runs the Pallas kernel).
    y_train = jax.block_until_ready(dropout(x, p, seed=1234, training=True))

    # Eval-mode path is identity (as in the PyTorch module).
    y_eval = jax.block_until_ready(dropout(x, p, training=False))

    # Sanity checks: shapes/dtypes preserved; surviving elements scaled by 1/(1-p);
    # dropped elements are exactly zero; eval path is identity.
    assert y_train.shape == x.shape and y_train.dtype == x.dtype
    assert bool(jnp.array_equal(y_eval, x))
    scale = 1.0 / (1.0 - p)
    kept = y_train != 0.0
    assert bool(jnp.allclose(jnp.where(kept, y_train, 0.0),
                             jnp.where(kept, x * scale, 0.0), atol=1e-5, rtol=1e-5))
    drop_frac = 1.0 - float(jnp.mean(kept.astype(jnp.float32)))
    assert 0.3 < drop_frac < 0.7  # loose statistical check around p=0.5

    # Ragged (non-multiple-of-128) shape exercises the padded-tail path.
    x2 = jax.random.normal(jax.random.PRNGKey(1), (3, 5, 7), dtype=jnp.float32)
    y2 = jax.block_until_ready(dropout(x2, 0.25, seed=7, training=True))
    kept2 = y2 != 0.0
    assert y2.shape == x2.shape and y2.dtype == x2.dtype
    assert bool(jnp.allclose(jnp.where(kept2, y2, 0.0),
                             jnp.where(kept2, x2 / (1.0 - 0.25), 0.0), atol=1e-5, rtol=1e-5))

    print("KERNEL_OK")
</pallas_src>

<mosaic_0001>
module attributes {stable_mosaic.version = 11 : i64} {
  func.func @_dropout_kernel(%arg0: i32, %arg1: memref<1xi32, #tpu.memory_space<smem>>, %arg2: memref<16x128xf32, #tpu.memory_space<vmem>>, %arg3: memref<16x128xf32, #tpu.memory_space<vmem>>) attributes {dimension_semantics = [#tpu.dimension_semantics<parallel>], iteration_bounds = array<i64: 1>, scalar_prefetch = 1 : i64, scratch_operands = 0 : i64, tpu.core_type = #tpu.core_type<tc>, window_params = [{transform_indices = @transform_0, window_bounds = array<i64: 16, 128>}, {transform_indices = @transform_1, window_bounds = array<i64: 16, 128>}]} {
    %c16_i32 = arith.constant 16 : i32
    %0 = arith.muli %arg0, %c16_i32 : i32
    %1 = tpu.iota {dimensions = array<i32: 0>} : vector<16x128xi32>
    %2 = tpu.iota {dimensions = array<i32: 1>} : vector<16x128xi32>
    %3 = vector.broadcast %0 : i32 to vector<16x128xi32>
    %4 = arith.addi %1, %3 : vector<16x128xi32>
    %c128_i32 = arith.constant 128 : i32
    %5 = vector.broadcast %c128_i32 : i32 to vector<16x128xi32>
    %6 = arith.muli %4, %5 : vector<16x128xi32>
    %7 = arith.addi %6, %2 : vector<16x128xi32>
    %c0 = arith.constant 0 : index
    %8 = memref.load %arg1[%c0] : memref<1xi32, #tpu.memory_space<smem>>
    %c-1640531527_i32 = arith.constant -1640531527 : i32
    %9 = vector.broadcast %c-1640531527_i32 : i32 to vector<16x128xi32>
    %10 = arith.muli %7, %9 : vector<16x128xi32>
    %c-2048144789_i32 = arith.constant -2048144789 : i32
    %11 = arith.muli %8, %c-2048144789_i32 : i32
    %12 = vector.broadcast %11 : i32 to vector<16x128xi32>
    %13 = arith.addi %10, %12 : vector<16x128xi32>
    %c1779033703_i32 = arith.constant 1779033703 : i32
    %14 = vector.broadcast %c1779033703_i32 : i32 to vector<16x128xi32>
    %15 = arith.addi %13, %14 : vector<16x128xi32>
    %c16_i32_0 = arith.constant 16 : i32
    %16 = vector.broadcast %c16_i32_0 : i32 to vector<16x128xi32>
    %17 = arith.shrui %15, %16 : vector<16x128xi32>
    %18 = arith.xori %15, %17 : vector<16x128xi32>
    %c569420461_i32 = arith.constant 569420461 : i32
    %19 = vector.broadcast %c569420461_i32 : i32 to vector<16x128xi32>
    %20 = arith.muli %18, %19 : vector<16x128xi32>
    %c15_i32 = arith.constant 15 : i32
    %21 = vector.broadcast %c15_i32 : i32 to vector<16x128xi32>
    %22 = arith.shrui %20, %21 : vector<16x128xi32>
    %23 = arith.xori %20, %22 : vector<16x128xi32>
    %c1935289751_i32 = arith.constant 1935289751 : i32
    %24 = vector.broadcast %c1935289751_i32 : i32 to vector<16x128xi32>
    %25 = arith.muli %23, %24 : vector<16x128xi32>
    %c15_i32_1 = arith.constant 15 : i32
    %26 = vector.broadcast %c15_i32_1 : i32 to vector<16x128xi32>
    %27 = arith.shrui %25, %26 : vector<16x128xi32>
    %28 = arith.xori %25, %27 : vector<16x128xi32>
    %c1_i32 = arith.constant 1 : i32
    %29 = vector.broadcast %c1_i32 : i32 to vector<16x128xi32>
    %30 = arith.shrui %28, %29 : vector<16x128xi32>
    %c1073741824_i32 = arith.constant 1073741824 : i32
    %31 = vector.broadcast %c1073741824_i32 : i32 to vector<16x128xi32>
    %32 = arith.cmpi sge, %30, %31 : vector<16x128xi32>
    %c0_2 = arith.constant 0 : index
    %c0_3 = arith.constant 0 : index
    %33 = vector.load %arg2[%c0_2, %c0_3] : memref<16x128xf32, #tpu.memory_space<vmem>>, vector<16x128xf32>
    %cst = arith.constant 2.000000e+00 : f32
    %34 = vector.broadcast %cst : f32 to vector<16x128xf32>
    %35 = arith.mulf %33, %34 : vector<16x128xf32>
    %cst_4 = arith.constant 0.000000e+00 : f32
    %36 = vector.broadcast %cst_4 : f32 to vector<16x128xf32>
    %37 = arith.select %32, %35, %36 : vector<16x128xi1>, vector<16x128xf32>
    %c0_5 = arith.constant 0 : index
    %c0_6 = arith.constant 0 : index
    %38 = vector.load %arg3[%c0_5, %c0_6] : memref<16x128xf32, #tpu.memory_space<vmem>>, vector<16x128xf32>
    tpu.vector_store %arg3[%c0_5, %c0_6], %37 {strides = array<i32>} : memref<16x128xf32, #tpu.memory_space<vmem>>, vector<16x128xf32>,
    return
  }
  func.func @transform_0(%arg0: i32, %arg1: memref<1xi32, #tpu.memory_space<smem>>) -> (i32, i32) {
    %c0_i32 = arith.constant 0 : i32
    %c0_i32_0 = arith.constant 0 : i32
    return %arg0, %c0_i32 : i32, i32
  }
  func.func @transform_1(%arg0: i32, %arg1: memref<1xi32, #tpu.memory_space<smem>>) -> (i32, i32) {
    %c0_i32 = arith.constant 0 : i32
    %c0_i32_0 = arith.constant 0 : i32
    return %arg0, %c0_i32 : i32, i32
  }
}

</mosaic_0001>

<bundles_post_ra>
// kernel: tpu_custom_call.1
= control target key start
LH: loop header
LB: loop body
LE: loop exit
PB: predicated region body
PF: predicated region fallthrough
CT: control target
= control target key end

     0   :  { %8 = vsyncpa [#allocation5], 0  ;;  %s186_s0 = inlined_call_operand.<no memory space> [shape: s32[1], index: 0, kind: input, shape index: {}]   ;;  %s187_s1 = inlined_call_operand.hbm [shape: f32[16,128], index: 1, kind: input, shape index: {}]   ;;  %s188_s2 = inlined_call_operand.hbm [shape: f32[16,128], index: 2, kind: output, shape index: {}]  }
   0x1   :  { %9 = vsyncpa [#allocation6], 0  ;;  %s14_s11 = sshll.u32 %s187_s1, 4  ;;  %s152_s12 = smov [#allocation4]   ;;  %s15_s11 = int_to_ptr.hbm [resolvable:$true] %s14_s11 }
   0x2   :  { %s16_s13 = sshll.u32 %s152_s12, 4  ;;  %s153_s14 = smov 128   ;;  %s17_s13 = int_to_ptr.vmem [resolvable:$true] %s16_s13 }
   0x3   :  { %s154_s15 = smov 8  }
   0x4   :  { %22 = dma.hbm_to_vmem [thread:$0]  %s15_s11, 256, %s17_s13, [#allocation5], %s153_s14, %s153_s14, %s154_s15  }
   0x5   :  { %148 = dma.done.wait [#allocation5], 256  }
   0x6   :  { %149 = vsyncadd [#allocation5], 4294967040  ;;  %v28_v0 = vlaneseq  ;;  %s43_s18 = smul.u32 2246822507, %s186_s0  ;;  %v69_v27 = vld [vmem:[#allocation4] sm:$0xff]  ;;  %v70_v31 = vld [vmem:[#allocation4 + $0x8] sm:$0xff] }
   0x7   :  { %v71_v32 = vmul.f32 2.0, %v69_v27  ;;  %v72_v35 = vmul.f32 2.0, %v70_v31  ;;  %s155_s0 = smov [#allocation7]   ;;  %s83_s21 = sshll.u32 %s188_s2, 4  ;;  %s84_s21 = int_to_ptr.hbm [resolvable:$true] %s83_s21 }
   0x8   :  { %v29_v1 = vshrl.u32 %v28_v0, 7  ;;  %v32_v2 = vand.u32 127, %v28_v0  ;;  %v44_v7 = vstv %s43_s18  ;;  %s81_s1 = sshll.u32 %s155_s0, 4  ;;  %s82_s1 = int_to_ptr.vmem [resolvable:$true] %s81_s1 }
   0xa   :  { %v36_v3 = vmul.u32 128, %v29_v1  ;;  %v30_v4 = vadd.s32 8, %v29_v1 }
   0xc   :  { %v38_v5 = vadd.s32 %v36_v3, %v32_v2  ;;  %v37_v6 = vmul.u32 128, %v30_v4 }
   0xe   :  { %v41_v8 = vmul.u32 2654435769, %v38_v5  ;;  %v39_v9 = vadd.s32 %v37_v6, %v32_v2 }
  0x10   :  { %v45_v10 = vadd.s32 %v44_v7, %v41_v8  ;;  %v42_v11 = vmul.u32 2654435769, %v39_v9 }
  0x12   :  { %v47_v12 = vadd.s32 1779033703, %v45_v10  ;;  %v46_v13 = vadd.s32 %v44_v7, %v42_v11 }
  0x14   :  { %v49_v14 = vshrl.u32 %v47_v12, 16  ;;  %v48_v15 = vadd.s32 1779033703, %v46_v13 }
  0x16   :  { %v51_v16 = vxor.u32 %v49_v14, %v47_v12  ;;  %v50_v17 = vshrl.u32 %v48_v15, 16 }
  0x18   :  { %v53_v18 = vmul.u32 569420461, %v51_v16  ;;  %v52_v19 = vxor.u32 %v50_v17, %v48_v15 }
  0x1a   :  { %v55_v20 = vshrl.u32 %v53_v18, 15  ;;  %v54_v21 = vmul.u32 569420461, %v52_v19 }
  0x1c   :  { %v57_v22 = vxor.u32 %v55_v20, %v53_v18  ;;  %v56_v23 = vshrl.u32 %v54_v21, 15 }
  0x1e   :  { %v59_v24 = vmul.u32 1935289751, %v57_v22  ;;  %v58_v25 = vxor.u32 %v56_v23, %v54_v21 }
  0x20   :  { %v61_v26 = vshrl.u32 %v59_v24, 15  ;;  %v60_v28 = vmul.u32 1935289751, %v58_v25 }
  0x22   :  { %v63_v29 = vxor.u32 %v61_v26, %v59_v24  ;;  %v62_v30 = vshrl.u32 %v60_v28, 15 }
  0x24   :  { %v65_v33 = vshrl.u32 %v63_v29, 1  ;;  %v64_v34 = vxor.u32 %v62_v30, %v60_v28 }
  0x26   :  { %vm67_vm0 = vcmp.ge.s32.totalorder %v65_v33, 1073741824  ;;  %v66_v36 = vshrl.u32 %v64_v34, 1 }
  0x27   :  { %v73_v37 = vsel %vm67_vm0, %v71_v32, 0.0 }
  0x28   :  { %75 = vst [vmem:[#allocation7] sm:$0xff] %v73_v37  ;;  %vm68_vm1 = vcmp.ge.s32.totalorder %v66_v36, 1073741824 }
  0x29   :  { %v74_v38 = vsel %vm68_vm1, %v72_v35, 0.0 }
  0x2a   :  { %76 = vst [vmem:[#allocation7 + $0x8] sm:$0xff] %v74_v38 }
  0x2b   :  { %89 = dma.vmem_to_hbm [thread:$0]  %s82_s1, 256, %s84_s21, [#allocation6], %s153_s14, %s153_s14, %s154_s15  }
  0x2c   :  { %150 = dma.done.wait [#allocation6], 256  }
  0x2d   :  { %151 = vsyncadd [#allocation6], 4294967040 }
  0x2e   :  { %94 = vsyncpa [#allocation5], 1 }
  0x2f   :  { %95 = vsyncpa [#allocation6], 1 }

</bundles_post_ra>
